<compile_context>
chip_gen: v6e
topology: v6e:2x2x1
jax: 0.10.0
libtpu: 0.0.40
codegen_flags: <defaults>
</compile_context>

<pallas_src>
import functools

import jax
import jax.numpy as jnp
from jax.experimental import pallas as pl
from jax.experimental.pallas import tpu as pltpu


# ---------------------------------------------------------------------------
# Kernels
# ---------------------------------------------------------------------------
def _make_base_kernel(batch, num_classes, tb):
    """Cross-entropy (mean over full batch) only -- distillation_type == 'none'."""
    inv_b = 1.0 / float(batch)

    def kernel(out_ref, lab_ref, loss_ref):
        s = out_ref[...]                                             # [tb, N] f32
        m = jnp.max(s, axis=-1, keepdims=True)
        lse = m + jnp.log(jnp.sum(jnp.exp(s - m), axis=-1, keepdims=True))
        iota = jax.lax.broadcasted_iota(jnp.int32, (tb, num_classes), 1)
        onehot = (iota == lab_ref[...]).astype(jnp.float32)          # labels: [tb,1] int32
        picked = jnp.sum(s * onehot, axis=-1, keepdims=True)
        loss_ref[0, 0] = jnp.sum(lse - picked) * inv_b               # per-block partial

    return kernel


def _make_distill_kernel(distillation_type, alpha, tau, batch, num_classes):
    """Fused teacher GEMM (K-streamed, batch resident) + base CE + (soft KL | hard CE)."""
    T = float(tau)
    alpha = float(alpha)
    inv_b = 1.0 / float(batch)
    inv_numel = 1.0 / float(batch * num_classes)

    def kernel(x_ref, w_ref, b_ref, out_ref, kd_ref, lab_ref, loss_ref, acc_ref):
        k = pl.program_id(0)

        @pl.when(k == 0)
        def _():
            acc_ref[...] = jnp.zeros_like(acc_ref)

        # Teacher GEMM partial sum: bf16 operands streamed on the MXU, f32 accumulation.
        # x is already bf16 (pre-cast in the wrapper) -> no per-step VPU convert.
        acc_ref[...] += jnp.dot(x_ref[...], w_ref[...],
                                preferred_element_type=jnp.float32)

        @pl.when(k == pl.num_programs(0) - 1)
        def _():
            # ---- base criterion: cross entropy on the class-token logits ----
            s = out_ref[...]                                         # [B, N] f32
            m = jnp.max(s, axis=-1, keepdims=True)
            lse = m + jnp.log(jnp.sum(jnp.exp(s - m), axis=-1, keepdims=True))
            iota = jax.lax.broadcasted_iota(jnp.int32, (batch, num_classes), 1)
            onehot = (iota == lab_ref[...]).astype(jnp.float32)
            picked = jnp.sum(s * onehot, axis=-1, keepdims=True)
            base_sum = jnp.sum(lse - picked)                         # sum over batch rows

            t_logits = acc_ref[...] + b_ref[...]                     # teacher logits [B, N]
            kd = kd_ref[...]                                         # dist-token logits

            if distillation_type == "soft":
                # F.kl_div(log_softmax(kd/T), log_softmax(t/T), 'sum', log_target=True)
                #   * T*T / kd.numel()
                kd_t = kd * (1.0 / T)
                tl_t = t_logits * (1.0 / T)
                m1 = jnp.max(kd_t, axis=-1, keepdims=True)
                e1 = jnp.exp(kd_t - m1)                              # one exp, reused
                logp_kd = kd_t - (m1 + jnp.log(jnp.sum(e1, axis=-1, keepdims=True)))
                m2 = jnp.max(tl_t, axis=-1, keepdims=True)
                e2 = jnp.exp(tl_t - m2)                              # one exp, reused
                s2 = jnp.sum(e2, axis=-1, keepdims=True)
                p_t = e2 / s2                                        # exact; runs once/call
                logp_t = tl_t - (m2 + jnp.log(s2))
                kl_sum = jnp.sum(p_t * (logp_t - logp_kd))
                distill = kl_sum * (T * T) * inv_numel
            else:  # "hard": cross_entropy(outputs_kd, teacher.argmax(dim=1)), mean
                tmax = jnp.max(t_logits, axis=-1, keepdims=True)
                cand = jnp.where(t_logits == tmax, iota, num_classes)
                argm = jnp.min(cand, axis=-1, keepdims=True)         # first-index argmax
                onehot_h = (iota == argm).astype(jnp.float32)
                mk = jnp.max(kd, axis=-1, keepdims=True)
                lsek = mk + jnp.log(jnp.sum(jnp.exp(kd - mk), axis=-1, keepdims=True))
                picked_k = jnp.sum(kd * onehot_h, axis=-1, keepdims=True)
                distill = jnp.sum(lsek - picked_k) * inv_b

            loss_ref[0, 0] = (1.0 - alpha) * base_sum * inv_b + alpha * distill

    return kernel


# ---------------------------------------------------------------------------
# Wrapper
# ---------------------------------------------------------------------------
def _largest_divisor_tile(dim, want, quantum):
    """Largest multiple of `quantum` dividing `dim` and <= want; falls back to `dim`."""
    want = min(want, dim)
    t = want - want % quantum
    while t >= quantum:
        if dim % t == 0:
            return t
        t -= quantum
    return dim


def _tpu_gen_params(num_classes):
    """Per-generation (tk target, VMEM cap): big enough weight blocks to hide the
    ~0.35-0.6 us per-grid-step overhead against each generation's HBM bandwidth, and a
    VMEM cap that leaves headroom on v7x (64 MiB/TC) while not starving v5e/v6e (128 MiB)."""
    kind = ""
    try:
        kind = jax.devices()[0].device_kind.lower()
    except Exception:
        pass
    if "v7" in kind:
        w_block_bytes, vmem_cap = 1 << 20, 40 * 1024 * 1024          # ~1 MB/step, 40 MiB cap
    elif "v6" in kind:
        w_block_bytes, vmem_cap = 512 * 1024, 96 * 1024 * 1024       # ~0.5 MB/step
    elif "v5" in kind:
        w_block_bytes, vmem_cap = 320 * 1024, 96 * 1024 * 1024       # ~0.3 MB/step
    else:
        w_block_bytes, vmem_cap = 512 * 1024, 64 * 1024 * 1024
    tk_target = max(256, w_block_bytes // (2 * num_classes))         # bf16 row = 2*N bytes
    return int(tk_target), int(vmem_cap)


@functools.partial(
    jax.jit,
    static_argnames=("distillation_type", "alpha", "tau", "tk_target", "vmem_cap", "tb"))
def _distillation_loss_impl(inputs, outputs, outputs_kd, labels, teacher_w, teacher_b,
                            *, distillation_type, alpha, tau, tk_target, vmem_cap, tb):
    B, N = outputs.shape
    outputs = outputs.astype(jnp.float32)
    labels2d = labels.reshape(B, 1).astype(jnp.int32)

    # -------- 'none': separate call, never touches teacher weights / outputs_kd --------
    if distillation_type == "none":
        tb = _largest_divisor_tile(B, tb, 8)
        nb = B // tb
        partial = pl.pallas_call(
            _make_base_kernel(B, N, tb),
            out_shape=jax.ShapeDtypeStruct((nb, 1), jnp.float32),
            grid=(nb,),
            in_specs=[pl.BlockSpec((tb, N), lambda b: (b, 0)),
                      pl.BlockSpec((tb, 1), lambda b: (b, 0))],
            out_specs=pl.BlockSpec((1, 1), lambda b: (b, 0),
                                   memory_space=pltpu.MemorySpace.SMEM),
            compiler_params=pltpu.CompilerParams(dimension_semantics=("parallel",)),
        )(outputs, labels2d)
        return jnp.sum(partial)

    # -------- 'soft' / 'hard': batch-resident, K-streamed teacher GEMM + fused epilogue ----
    x_flat = inputs.reshape(B, -1).astype(jnp.bfloat16)    # same as torch .flatten(1); bf16
    D = x_flat.shape[1]
    w_bf16 = teacher_w.astype(jnp.bfloat16)                # bf16 HBM stream (dominant array)
    bias2d = teacher_b.reshape(1, N).astype(jnp.float32)
    outputs_kd = outputs_kd.astype(jnp.float32)

    # Resident VMEM (outputs, outputs_kd, bias, labels double-buffered + f32 accumulator).
    resid_bytes = 2 * (2 * B * N * 4 + N * 4 + B * 4) + B * N * 4
    # Clamp tk so double-buffered (x block + w block) fits within ~3/4 of the cap.
    per_tk_bytes = 2 * (B * 2 + N * 2)
    tk_vmem_max = max(128, (vmem_cap * 3 // 4 - resid_bytes) // per_tk_bytes)
    tk = _largest_divisor_tile(D, min(tk_target, tk_vmem_max), 128)
    nk = D // tk

    vmem_bytes = resid_bytes + 2 * (B * tk * 2 + tk * N * 2)
    vmem_limit = int(min(max(2 * vmem_bytes, 16 * 1024 * 1024), vmem_cap))

    # Weights are streamed exactly once -> bytes_accessed matches real traffic.
    cost = pl.CostEstimate(
        flops=2 * B * D * N,
        transcendentals=4 * B * N,
        bytes_accessed=D * N * 2 + B * D * 2 + 3 * B * N * 4 + N * 4 + B * 4,
    )

    partial = pl.pallas_call(
        _make_distill_kernel(distillation_type, alpha, tau, B, N),
        out_shape=jax.ShapeDtypeStruct((1, 1), jnp.float32),
        grid=(nk,),                                        # K is the only (arbitrary) axis
        in_specs=[
            pl.BlockSpec((B, tk), lambda k: (0, k)),       # x_flat    [B, D] bf16
            pl.BlockSpec((tk, N), lambda k: (k, 0)),       # teacher_w [D, N] bf16 (streamed)
            pl.BlockSpec((1, N), lambda k: (0, 0)),        # bias      [1, N] f32 (resident)
            pl.BlockSpec((B, N), lambda k: (0, 0)),        # outputs   [B, N] f32 (resident)
            pl.BlockSpec((B, N), lambda k: (0, 0)),        # outputs_kd[B, N] f32 (resident)
            pl.BlockSpec((B, 1), lambda k: (0, 0)),        # labels    [B, 1] i32 (resident)
        ],
        out_specs=pl.BlockSpec((1, 1), lambda k: (0, 0),
                               memory_space=pltpu.MemorySpace.SMEM),
        scratch_shapes=[pltpu.VMEM((B, N), jnp.float32)],  # teacher-logit accumulator
        compiler_params=pltpu.CompilerParams(
            dimension_semantics=("arbitrary",),            # single TC; HBM-bound GEMV
            vmem_limit_bytes=vmem_limit),
        cost_estimate=cost,
    )(x_flat, w_bf16, bias2d, outputs, outputs_kd, labels2d)

    return partial[0, 0]


def distillation_loss(inputs, outputs, outputs_kd, labels, teacher_w, teacher_b,
                      *, distillation_type="soft", alpha=0.5, tau=1.0, tb=128):
    """JAX/Pallas equivalent of DistillationLoss.forward(inputs, (outputs, outputs_kd), labels)."""
    num_classes = outputs.shape[1]
    tk_target, vmem_cap = _tpu_gen_params(num_classes)
    return _distillation_loss_impl(
        inputs, outputs, outputs_kd, labels, teacher_w, teacher_b,
        distillation_type=distillation_type, alpha=float(alpha), tau=float(tau),
        tk_target=tk_target, vmem_cap=vmem_cap, tb=tb)


# ---------------- pure-JAX reference (correctness check only) ----------------
def _reference(inputs, outputs, outputs_kd, labels, w, b, distillation_type, alpha, tau):
    B, N = outputs.shape
    logp = jax.nn.log_softmax(outputs.astype(jnp.float32), axis=1)
    base = -jnp.mean(jnp.take_along_axis(logp, labels[:, None], axis=1))
    if distillation_type == "none":
        return base
    # match the kernel's bf16 operand streaming (f32 accumulation)
    x_bf = inputs.reshape(B, -1).astype(jnp.bfloat16).astype(jnp.float32)
    w_bf = w.astype(jnp.bfloat16).astype(jnp.float32)
    t_logits = x_bf @ w_bf + b.reshape(1, N)
    if distillation_type == "soft":
        T = tau
        lp_kd = jax.nn.log_softmax(outputs_kd / T, axis=1)
        lp_t = jax.nn.log_softmax(t_logits / T, axis=1)
        kl = jnp.sum(jnp.exp(lp_t) * (lp_t - lp_kd))
        distill = kl * (T * T) / (B * N)
    else:
        hard = jnp.argmax(t_logits, axis=1)
        lp_kd = jax.nn.log_softmax(outputs_kd, axis=1)
        distill = -jnp.mean(jnp.take_along_axis(lp_kd, hard[:, None], axis=1))
    return base * (1 - alpha) + distill * alpha


if __name__ == "__main__":
    key = jax.random.PRNGKey(0)
    k_in, k_out, k_kd, k_lab, k_w, k_b = jax.random.split(key, 6)

    B, C, H, W = 16, 4, 16, 16          # teacher input (NCHW, as in PyTorch)
    N = 128                             # number of classes
    D = C * H * W                       # 1024

    inputs = jax.random.normal(k_in, (B, C, H, W), jnp.float32)
    outputs = jax.random.normal(k_out, (B, N), jnp.float32)        # class-token logits
    outputs_kd = jax.random.normal(k_kd, (B, N), jnp.float32)      # dist-token logits
    labels = jax.random.randint(k_lab, (B,), 0, N, jnp.int32)

    # deterministic synthetic teacher (flatten + linear)
    teacher_w = jax.random.normal(k_w, (D, N), jnp.float32) * 0.02
    teacher_b = jax.random.normal(k_b, (N,), jnp.float32) * 0.05

    configs = [("soft", 0.5, 2.0), ("hard", 0.5, 1.0), ("none", 0.5, 1.0)]
    for dist_type, alpha, tau in configs:
        got = distillation_loss(inputs, outputs, outputs_kd, labels,
                                teacher_w, teacher_b,
                                distillation_type=dist_type, alpha=alpha, tau=tau)
        got = jax.block_until_ready(got)
        ref = _reference(inputs, outputs, outputs_kd, labels, teacher_w, teacher_b,
                         dist_type, alpha, tau)
        if not jnp.allclose(got, ref, rtol=5e-3, atol=5e-4):
            raise AssertionError(f"{dist_type}: pallas={got} ref={ref}")

    print("KERNEL_OK")
</pallas_src>

<mosaic_0001>
module attributes {stable_mosaic.version = 11 : i64} {
  func.func @kernel(%arg0: i32, %arg1: memref<16x1024xbf16, #tpu.memory_space<vmem>>, %arg2: memref<1024x128xbf16, #tpu.memory_space<vmem>>, %arg3: memref<1x128xf32, #tpu.memory_space<vmem>>, %arg4: memref<16x128xf32, #tpu.memory_space<vmem>>, %arg5: memref<16x128xf32, #tpu.memory_space<vmem>>, %arg6: memref<16x1xi32, #tpu.memory_space<vmem>>, %arg7: memref<1x1xf32, #tpu.memory_space<smem>>, %arg8: memref<16x128xf32, #tpu.memory_space<vmem>>) attributes {dimension_semantics = [#tpu.dimension_semantics<arbitrary>], iteration_bounds = array<i64: 1>, scalar_prefetch = 0 : i64, scratch_operands = 1 : i64, tpu.core_type = #tpu.core_type<tc>, window_params = [{transform_indices = @transform_0, window_bounds = array<i64: 16, 1024>}, {transform_indices = @transform_1, window_bounds = array<i64: 1024, 128>}, {pipeline_mode = #tpu.pipeline_mode<synchronous>, transform_indices = @transform_2, window_bounds = array<i64: 1, 128>}, {pipeline_mode = #tpu.pipeline_mode<synchronous>, transform_indices = @transform_3, window_bounds = array<i64: 16, 128>}, {pipeline_mode = #tpu.pipeline_mode<synchronous>, transform_indices = @transform_4, window_bounds = array<i64: 16, 128>}, {pipeline_mode = #tpu.pipeline_mode<synchronous>, transform_indices = @transform_5, window_bounds = array<i64: 16, 1>}, {transform_indices = @transform_6, window_bounds = array<i64: 1, 1>}]} {
    %c0_i32 = arith.constant 0 : i32
    %0 = arith.cmpi eq, %arg0, %c0_i32 : i32
    %1 = arith.extui %0 : i1 to i32
    %c0_i32_0 = arith.constant 0 : i32
    %2 = arith.cmpi ne, %1, %c0_i32_0 : i32
    scf.if %2 {
      %cst_10 = arith.constant 0.000000e+00 : f32
      %12 = vector.broadcast %cst_10 : f32 to vector<16x128xf32>
      %c0_11 = arith.constant 0 : index
      %c0_12 = arith.constant 0 : index
      %13 = vector.load %arg8[%c0_11, %c0_12] : memref<16x128xf32, #tpu.memory_space<vmem>>, vector<16x128xf32>
      tpu.vector_store %arg8[%c0_11, %c0_12], %12 {strides = array<i32>} : memref<16x128xf32, #tpu.memory_space<vmem>>, vector<16x128xf32>,
    } else {
    }
    %c0 = arith.constant 0 : index
    %c0_1 = arith.constant 0 : index
    %3 = vector.load %arg8[%c0, %c0_1] : memref<16x128xf32, #tpu.memory_space<vmem>>, vector<16x128xf32>
    %c0_2 = arith.constant 0 : index
    %c0_3 = arith.constant 0 : index
    %4 = vector.load %arg1[%c0_2, %c0_3] : memref<16x1024xbf16, #tpu.memory_space<vmem>>, vector<16x1024xbf16>
    %c0_4 = arith.constant 0 : index
    %c0_5 = arith.constant 0 : index
    %5 = vector.load %arg2[%c0_4, %c0_5] : memref<1024x128xbf16, #tpu.memory_space<vmem>>, vector<1024x128xbf16>
    %cst = arith.constant dense<0.000000e+00> : vector<16x128xf32>
    %6 = tpu.matmul %4, %5, %cst {dimension_numbers = #tpu.dot_dimension_numbers<[1], [0], [0], [1], [0, 0, 1, 1], [], []>} : vector<16x1024xbf16>, vector<1024x128xbf16>, vector<16x128xf32> -> vector<16x128xf32>
    %7 = arith.addf %3, %6 : vector<16x128xf32>
    %c0_6 = arith.constant 0 : index
    %c0_7 = arith.constant 0 : index
    %8 = vector.load %arg8[%c0_6, %c0_7] : memref<16x128xf32, #tpu.memory_space<vmem>>, vector<16x128xf32>
    tpu.vector_store %arg8[%c0_6, %c0_7], %7 {strides = array<i32>} : memref<16x128xf32, #tpu.memory_space<vmem>>, vector<16x128xf32>,
    %c0_i32_8 = arith.constant 0 : i32
    %9 = arith.cmpi eq, %arg0, %c0_i32_8 : i32
    %10 = arith.extui %9 : i1 to i32
    %c0_i32_9 = arith.constant 0 : i32
    %11 = arith.cmpi ne, %10, %c0_i32_9 : i32
    scf.if %11 {
      %c0_10 = arith.constant 0 : index
      %c0_11 = arith.constant 0 : index
      %12 = vector.load %arg4[%c0_10, %c0_11] : memref<16x128xf32, #tpu.memory_space<vmem>>, vector<16x128xf32>
      %cst_12 = arith.constant dense<0xFF800000> : vector<16xf32>
      %13 = vector.multi_reduction <maximumf>, %12, %cst_12 [1] : vector<16x128xf32> to vector<16xf32>
      %14 = vector.shape_cast %13 : vector<16xf32> to vector<16x1xf32>
      %15 = vector.broadcast %14 : vector<16x1xf32> to vector<16x128xf32>
      %16 = arith.subf %12, %15 : vector<16x128xf32>
      %17 = math.exp %16 : vector<16x128xf32>
      %cst_13 = arith.constant dense<0.000000e+00> : vector<16xf32>
      %18 = vector.multi_reduction <add>, %17, %cst_13 [1] : vector<16x128xf32> to vector<16xf32>
      %19 = vector.shape_cast %18 : vector<16xf32> to vector<16x1xf32>
      %20 = math.log %19 : vector<16x1xf32>
      %21 = arith.addf %14, %20 : vector<16x1xf32>
      %22 = tpu.iota {dimensions = array<i32: 1>} : vector<16x128xi32>
      %c0_14 = arith.constant 0 : index
      %c0_15 = arith.constant 0 : index
      %23 = vector.load %arg6[%c0_14, %c0_15] : memref<16x1xi32, #tpu.memory_space<vmem>>, vector<16x1xi32>
      %24 = vector.broadcast %23 : vector<16x1xi32> to vector<16x128xi32>
      %25 = arith.cmpi eq, %22, %24 : vector<16x128xi32>
      %26 = arith.extui %25 : vector<16x128xi1> to vector<16x128xi32>
      %27 = arith.sitofp %26 : vector<16x128xi32> to vector<16x128xf32>
      %28 = arith.mulf %12, %27 : vector<16x128xf32>
      %cst_16 = arith.constant dense<0.000000e+00> : vector<16xf32>
      %29 = vector.multi_reduction <add>, %28, %cst_16 [1] : vector<16x128xf32> to vector<16xf32>
      %30 = vector.shape_cast %29 : vector<16xf32> to vector<16x1xf32>
      %31 = arith.subf %21, %30 : vector<16x1xf32>
      %32 = vector.shape_cast %31 : vector<16x1xf32> to vector<1x16x1xf32>
      %cst_17 = arith.constant dense<0.000000e+00> : vector<1xf32>
      %33 = vector.multi_reduction <add>, %32, %cst_17 [1, 2] : vector<1x16x1xf32> to vector<1xf32>
      %34 = vector.shape_cast %33 : vector<1xf32> to vector<1x1x1xf32>
      %35 = vector.extract %34[0, 0, 0] : f32 from vector<1x1x1xf32>
      %c0_18 = arith.constant 0 : index
      %c0_19 = arith.constant 0 : index
      %36 = vector.load %arg8[%c0_18, %c0_19] : memref<16x128xf32, #tpu.memory_space<vmem>>, vector<16x128xf32>
      %c0_20 = arith.constant 0 : index
      %c0_21 = arith.constant 0 : index
      %37 = vector.load %arg3[%c0_20, %c0_21] : memref<1x128xf32, #tpu.memory_space<vmem>>, vector<1x128xf32>
      %38 = vector.broadcast %37 : vector<1x128xf32> to vector<16x128xf32>
      %39 = arith.addf %36, %38 : vector<16x128xf32>
      %c0_22 = arith.constant 0 : index
      %c0_23 = arith.constant 0 : index
      %40 = vector.load %arg5[%c0_22, %c0_23] : memref<16x128xf32, #tpu.memory_space<vmem>>, vector<16x128xf32>
      %cst_24 = arith.constant 5.000000e-01 : f32
      %41 = vector.broadcast %cst_24 : f32 to vector<16x128xf32>
      %42 = arith.mulf %40, %41 : vector<16x128xf32>
      %cst_25 = arith.constant 5.000000e-01 : f32
      %43 = vector.broadcast %cst_25 : f32 to vector<16x128xf32>
      %44 = arith.mulf %39, %43 : vector<16x128xf32>
      %cst_26 = arith.constant dense<0xFF800000> : vector<16xf32>
      %45 = vector.multi_reduction <maximumf>, %42, %cst_26 [1] : vector<16x128xf32> to vector<16xf32>
      %46 = vector.shape_cast %45 : vector<16xf32> to vector<16x1xf32>
      %47 = vector.broadcast %46 : vector<16x1xf32> to vector<16x128xf32>
      %48 = arith.subf %42, %47 : vector<16x128xf32>
      %49 = math.exp %48 : vector<16x128xf32>
      %cst_27 = arith.constant dense<0.000000e+00> : vector<16xf32>
      %50 = vector.multi_reduction <add>, %49, %cst_27 [1] : vector<16x128xf32> to vector<16xf32>
      %51 = vector.shape_cast %50 : vector<16xf32> to vector<16x1xf32>
      %52 = math.log %51 : vector<16x1xf32>
      %53 = arith.addf %46, %52 : vector<16x1xf32>
      %54 = vector.broadcast %53 : vector<16x1xf32> to vector<16x128xf32>
      %55 = arith.subf %42, %54 : vector<16x128xf32>
      %cst_28 = arith.constant dense<0xFF800000> : vector<16xf32>
      %56 = vector.multi_reduction <maximumf>, %44, %cst_28 [1] : vector<16x128xf32> to vector<16xf32>
      %57 = vector.shape_cast %56 : vector<16xf32> to vector<16x1xf32>
      %58 = vector.broadcast %57 : vector<16x1xf32> to vector<16x128xf32>
      %59 = arith.subf %44, %58 : vector<16x128xf32>
      %60 = math.exp %59 : vector<16x128xf32>
      %cst_29 = arith.constant dense<0.000000e+00> : vector<16xf32>
      %61 = vector.multi_reduction <add>, %60, %cst_29 [1] : vector<16x128xf32> to vector<16xf32>
      %62 = vector.shape_cast %61 : vector<16xf32> to vector<16x1xf32>
      %63 = vector.broadcast %62 : vector<16x1xf32> to vector<16x128xf32>
      %64 = arith.divf %60, %63 : vector<16x128xf32>
      %65 = math.log %62 : vector<16x1xf32>
      %66 = arith.addf %57, %65 : vector<16x1xf32>
      %67 = vector.broadcast %66 : vector<16x1xf32> to vector<16x128xf32>
      %68 = arith.subf %44, %67 : vector<16x128xf32>
      %69 = arith.subf %68, %55 : vector<16x128xf32>
      %70 = arith.mulf %64, %69 : vector<16x128xf32>
      %71 = vector.shape_cast %70 : vector<16x128xf32> to vector<1x16x128xf32>
      %cst_30 = arith.constant dense<0.000000e+00> : vector<1xf32>
      %72 = vector.multi_reduction <add>, %71, %cst_30 [1, 2] : vector<1x16x128xf32> to vector<1xf32>
      %73 = vector.shape_cast %72 : vector<1xf32> to vector<1x1x1xf32>
      %74 = vector.extract %73[0, 0, 0] : f32 from vector<1x1x1xf32>
      %cst_31 = arith.constant 4.000000e+00 : f32
      %75 = arith.mulf %74, %cst_31 : f32
      %cst_32 = arith.constant 4.8828125E-4 : f32
      %76 = arith.mulf %75, %cst_32 : f32
      %cst_33 = arith.constant 5.000000e-01 : f32
      %77 = arith.mulf %cst_33, %35 : f32
      %cst_34 = arith.constant 6.250000e-02 : f32
      %78 = arith.mulf %77, %cst_34 : f32
      %cst_35 = arith.constant 5.000000e-01 : f32
      %79 = arith.mulf %cst_35, %76 : f32
      %80 = arith.addf %78, %79 : f32
      %c0_36 = arith.constant 0 : index
      %c0_37 = arith.constant 0 : index
      %81 = memref.load %arg7[%c0_36, %c0_37] : memref<1x1xf32, #tpu.memory_space<smem>>
      memref.store %80, %arg7[%c0_36, %c0_37] : memref<1x1xf32, #tpu.memory_space<smem>>
    } else {
    }
    return
  }
  func.func @transform_0(%arg0: i32) -> (i32, i32) {
    %c0_i32 = arith.constant 0 : i32
    %c0_i32_0 = arith.constant 0 : i32
    return %c0_i32, %arg0 : i32, i32
  }
  func.func @transform_1(%arg0: i32) -> (i32, i32) {
    %c0_i32 = arith.constant 0 : i32
    %c0_i32_0 = arith.constant 0 : i32
    return %arg0, %c0_i32 : i32, i32
  }
  func.func @transform_2(%arg0: i32) -> (i32, i32) {
    %c0_i32 = arith.constant 0 : i32
    %c0_i32_0 = arith.constant 0 : i32
    %c0_i32_1 = arith.constant 0 : i32
    return %c0_i32, %c0_i32_0 : i32, i32
  }
  func.func @transform_3(%arg0: i32) -> (i32, i32) {
    %c0_i32 = arith.constant 0 : i32
    %c0_i32_0 = arith.constant 0 : i32
    %c0_i32_1 = arith.constant 0 : i32
    return %c0_i32, %c0_i32_0 : i32, i32
  }
  func.func @transform_4(%arg0: i32) -> (i32, i32) {
    %c0_i32 = arith.constant 0 : i32
    %c0_i32_0 = arith.constant 0 : i32
    %c0_i32_1 = arith.constant 0 : i32
    return %c0_i32, %c0_i32_0 : i32, i32
  }
  func.func @transform_5(%arg0: i32) -> (i32, i32) {
    %c0_i32 = arith.constant 0 : i32
    %c0_i32_0 = arith.constant 0 : i32
    %c0_i32_1 = arith.constant 0 : i32
    return %c0_i32, %c0_i32_0 : i32, i32
  }
  func.func @transform_6(%arg0: i32) -> (i32, i32) {
    %c0_i32 = arith.constant 0 : i32
    %c0_i32_0 = arith.constant 0 : i32
    %c0_i32_1 = arith.constant 0 : i32
    return %c0_i32, %c0_i32_0 : i32, i32
  }
}

</mosaic_0001>

<bundles_post_ra>
// kernel: _distillation_loss_impl.1
= control target key start
LH: loop header
LB: loop body
LE: loop exit
PB: predicated region body
PF: predicated region fallthrough
CT: control target
= control target key end

     0   :  { %v1197_v2 = vmov 0   ;;  %s1516_s0 = inlined_call_operand.vmem [shape: bf16[16,1024], index: 0, kind: input, shape index: {}]   ;;  %s1517_s1 = inlined_call_operand.vmem [shape: bf16[1024,128], index: 1, kind: input, shape index: {}]   ;;  %s1518_s2 = inlined_call_operand.vmem [shape: f32[1,128], index: 2, kind: input, shape index: {}]   ;;  %s1519_s3 = inlined_call_operand.vmem [shape: f32[16,128], index: 3, kind: input, shape index: {}]   ;;  %s1520_s4 = inlined_call_operand.vmem [shape: f32[16,128], index: 4, kind: input, shape index: {}]   ;;  %s1521_s5 = inlined_call_operand.vmem [shape: s32[16,1], index: 5, kind: input, shape index: {}]   ;;  %s1522_s6 = inlined_call_operand.hbm [shape: f32[1,1], index: 6, kind: output, shape index: {}]  }
   0x1   :  { %v1095_v0 = vld [vmem:[%s1517_s1 + $0x78] sm:$0xff]   ;;  %1093 = vset.pattern.permute.xlu0 %v1197_v2  ;;  %1094 = vset.pattern.permute.xlu1 %v1197_v2  ;;  %v1099_v5 = vld [vmem:[%s1517_s1 + $0x70] sm:$0xff]   ;;  %v1103_v9 = vld [vmem:[%s1517_s1 + $0x68] sm:$0xff]  }
   0x2   :  { %v1096_v1 = vld [vmem:[%s1517_s1 + $0xf8] sm:$0xff]   ;;  %998 = vmatprep.subr.bf16.mxu0 %v1095_v0  ;;  %v1100_v6 = vld [vmem:[%s1517_s1 + $0xf0] sm:$0xff]   ;;  %v1104_v10 = vld [vmem:[%s1517_s1 + $0xe8] sm:$0xff]  }
   0x3   :  { %v1097_v3 = vld [vmem:[%s1517_s1 + $0x38] sm:$0xff]   ;;  %1020 = vmatprep.subr.bf16.mxu1 %v1096_v1  ;;  %v1101_v7 = vld [vmem:[%s1517_s1 + $0x30] sm:$0xff]   ;;  %v1105_v11 = vld [vmem:[%s1517_s1 + $0x28] sm:$0xff]  }
   0x4   :  { %v1098_v4 = vld [vmem:[%s1517_s1 + $0xb8] sm:$0xff]   ;;  %999 = vmatpush3.bf16.msra.mxu0 %v1097_v3  ;;  %v1102_v8 = vld [vmem:[%s1517_s1 + $0xb0] sm:$0xff]   ;;  %v1106_v12 = vld [vmem:[%s1517_s1 + $0xa8] sm:$0xff]  }
   0x5   :  { %1021 = vmatpush3.bf16.msra.mxu1 %v1098_v4  ;;  %1000 = vmatprep.subr.bf16.mxu0 %v1099_v5  ;;  %v1107_v13 = vld [vmem:[%s1517_s1 + $0x60] sm:$0xff]   ;;  %v1111_v17 = vld [vmem:[%s1517_s1 + $0x58] sm:$0xff]   ;;  %v1115_v21 = vld [vmem:[%s1517_s1 + $0x50] sm:$0xff]  }
   0x6   :  { %1022 = vmatprep.subr.bf16.mxu1 %v1100_v6  ;;  %v1108_v14 = vld [vmem:[%s1517_s1 + $0xe0] sm:$0xff]   ;;  %v1112_v18 = vld [vmem:[%s1517_s1 + $0xd8] sm:$0xff]   ;;  %v1116_v22 = vld [vmem:[%s1517_s1 + $0xd0] sm:$0xff]  }
   0x7   :  { %v1109_v15 = vld [vmem:[%s1517_s1 + $0x20] sm:$0xff]   ;;  %v1113_v19 = vld [vmem:[%s1517_s1 + $0x18] sm:$0xff]   ;;  %v1117_v23 = vld [vmem:[%s1517_s1 + $0x10] sm:$0xff]  }
   0x8   :  { %1001 = vmatpush3.bf16.msra.mxu0 %v1101_v7  ;;  %v1110_v16 = vld [vmem:[%s1517_s1 + $0xa0] sm:$0xff]   ;;  %v1114_v20 = vld [vmem:[%s1517_s1 + $0x98] sm:$0xff]   ;;  %v1118_v24 = vld [vmem:[%s1517_s1 + $0x90] sm:$0xff]  }
   0x9   :  { %1023 = vmatpush3.bf16.msra.mxu1 %v1102_v8  ;;  %1002 = vmatprep.subr.bf16.mxu0 %v1103_v9  ;;  %v1119_v25 = vld [vmem:[%s1517_s1 + $0x48] sm:$0xff]   ;;  %v1123_v29 = vld [vmem:[%s1517_s1 + $0x40] sm:$0xff]   ;;  %v1127_v41 = vld [vmem:[%s1517_s1 + $0x178] sm:$0xff]  }
   0xa   :  { %1024 = vmatprep.subr.bf16.mxu1 %v1104_v10  ;;  %v1120_v26 = vld [vmem:[%s1517_s1 + $0xc8] sm:$0xff]   ;;  %v1124_v30 = vld [vmem:[%s1517_s1 + $0xc0] sm:$0xff]   ;;  %v1128_v42 = vld [vmem:[%s1517_s1 + $0x1f8] sm:$0xff]  }
   0xb   :  { %v1121_v27 = vld [vmem:[%s1517_s1 + $0x8] sm:$0xff]   ;;  %v1125_v31 = vld [vmem:[%s1517_s1] sm:$0xff]   ;;  %v1129_v43 = vld [vmem:[%s1517_s1 + $0x138] sm:$0xff]  }
   0xc   :  { %1003 = vmatpush3.bf16.msra.mxu0 %v1105_v11  ;;  %v1122_v28 = vld [vmem:[%s1517_s1 + $0x88] sm:$0xff]   ;;  %v1126_v32 = vld [vmem:[%s1517_s1 + $0x80] sm:$0xff]   ;;  %v1130_v44 = vld [vmem:[%s1517_s1 + $0x1b8] sm:$0xff]  }
   0xd   :  { %1025 = vmatpush3.bf16.msra.mxu1 %v1106_v12  ;;  %1004 = vmatprep.subr.bf16.mxu0 %v1107_v13  ;;  %v33_v33 = vld [vmem:[%s1516_s0] sm:$0xff]  ;;  %v34_v35 = vld [vmem:[%s1516_s0 + $0x8] sm:$0xff]  ;;  %v1131_v45 = vld [vmem:[%s1517_s1 + $0x170] sm:$0xff]  }
   0xe   :  { %1026 = vmatprep.subr.bf16.mxu1 %v1108_v14  ;;  %v37_v34 = vld [vmem:[%s1516_s0 + $0x20] sm:$0xff]  ;;  %v38_v38 = vld [vmem:[%s1516_s0 + $0x28] sm:$0xff]  ;;  %v1132_v46 = vld [vmem:[%s1517_s1 + $0x1f0] sm:$0xff]  }
   0xf   :  { %v923_v36 = vcombine.low %v33_v33, %v37_v34  ;;  %v924_v37 = vcombine.high %v33_v33, %v37_v34  ;;  %v925_v39 = vcombine.low %v34_v35, %v38_v38  ;;  %v926_v40 = vcombine.high %v34_v35, %v38_v38  ;;  %v1133_v47 = vld [vmem:[%s1517_s1 + $0x130] sm:$0xff]   ;;  %v1135_v49 = vld [vmem:[%s1517_s1 + $0x168] sm:$0xff]   ;;  %v1139_v53 = vld [vmem:[%s1517_s1 + $0x160] sm:$0xff]  }
  0x10   :  { %1005 = vmatpush3.bf16.msra.mxu0 %v1109_v15  ;;  %v1134_v48 = vld [vmem:[%s1517_s1 + $0x1b0] sm:$0xff]   ;;  %v1136_v50 = vld [vmem:[%s1517_s1 + $0x1e8] sm:$0xff]   ;;  %v1140_v54 = vld [vmem:[%s1517_s1 + $0x1e0] sm:$0xff]  }
  0x11   :  { %1027 = vmatpush3.bf16.msra.mxu1 %v1110_v16  ;;  %1006 = vmatprep.subr.bf16.mxu0 %v1111_v17  ;;  %v1137_v51 = vld [vmem:[%s1517_s1 + $0x128] sm:$0xff]   ;;  %v1141_v55 = vld [vmem:[%s1517_s1 + $0x120] sm:$0xff]   ;;  %v1143_v57 = vld [vmem:[%s1517_s1 + $0x158] sm:$0xff]  }
  0x12   :  { %1028 = vmatprep.subr.bf16.mxu1 %v1112_v18  ;;  %625 = vmatprep.mubr.bf16.mxu0 %v924_v37  ;;  %v1138_v52 = vld [vmem:[%s1517_s1 + $0x1a8] sm:$0xff]   ;;  %v1142_v56 = vld [vmem:[%s1517_s1 + $0x1a0] sm:$0xff]   ;;  %v1144_v58 = vld [vmem:[%s1517_s1 + $0x1d8] sm:$0xff]  }
  0x13   :  { %666 = vmatprep.mubr.bf16.mxu1 %v926_v40  ;;  %v1145_v59 = vld [vmem:[%s1517_s1 + $0x118] sm:$0xff]   ;;  %v1147_v61 = vld [vmem:[%s1517_s1 + $0x150] sm:$0xff]   ;;  %v1151_v1 = vld [vmem:[%s1517_s1 + $0x148] sm:$0xff]  }
  0x14   :  { %1007 = vmatpush3.bf16.msra.mxu0 %v1113_v19  ;;  %v1146_v60 = vld [vmem:[%s1517_s1 + $0x198] sm:$0xff]   ;;  %v1148_v62 = vld [vmem:[%s1517_s1 + $0x1d0] sm:$0xff]   ;;  %v1152_v2 = vld [vmem:[%s1517_s1 + $0x1c8] sm:$0xff]  }
  0x15   :  { %1029 = vmatpush3.bf16.msra.mxu1 %v1114_v20  ;;  %1008 = vmatprep.subr.bf16.mxu0 %v1115_v21  ;;  %v1149_v63 = vld [vmem:[%s1517_s1 + $0x110] sm:$0xff]   ;;  %v1153_v3 = vld [vmem:[%s1517_s1 + $0x108] sm:$0xff]   ;;  %v1155_v5 = vld [vmem:[%s1517_s1 + $0x140] sm:$0xff]  }
  0x16   :  { %1030 = vmatprep.subr.bf16.mxu1 %v1116_v22  ;;  %v1150_v0 = vld [vmem:[%s1517_s1 + $0x190] sm:$0xff]   ;;  %v1154_v4 = vld [vmem:[%s1517_s1 + $0x188] sm:$0xff]   ;;  %v1156_v6 = vld [vmem:[%s1517_s1 + $0x1c0] sm:$0xff]  }
  0x17   :  { %v1157_v7 = vld [vmem:[%s1517_s1 + $0x100] sm:$0xff]   ;;  %v35_v9 = vld [vmem:[%s1516_s0 + $0x10] sm:$0xff]  ;;  %v36_v13 = vld [vmem:[%s1516_s0 + $0x18] sm:$0xff] }
  0x18   :  { %1009 = vmatpush3.bf16.msra.mxu0 %v1117_v23  ;;  %v1158_v8 = vld [vmem:[%s1517_s1 + $0x180] sm:$0xff]   ;;  %v39_v10 = vld [vmem:[%s1516_s0 + $0x30] sm:$0xff]  ;;  %v40_v14 = vld [vmem:[%s1516_s0 + $0x38] sm:$0xff] }
  0x19   :  { %1031 = vmatpush3.bf16.msra.mxu1 %v1118_v24  ;;  %1010 = vmatprep.subr.bf16.mxu0 %v1119_v25  ;;  %v927_v11 = vcombine.low %v35_v9, %v39_v10  ;;  %v928_v12 = vcombine.high %v35_v9, %v39_v10  ;;  %v834_v15 = vld [vmem:[%s1520_s4] sm:$0xff]  ;;  %v929_v16 = vcombine.low %v36_v13, %v40_v14  ;;  %v835_v19 = vld [vmem:[%s1520_s4 + $0x8] sm:$0xff] }
  0x1a   :  { %1032 = vmatprep.subr.bf16.mxu1 %v1120_v26  ;;  %v930_v17 = vcombine.high %v36_v13, %v40_v14  ;;  %v1454_v18 = vmul.f32 0.5, %v834_v15 }
  0x1c   :  { %1011 = vmatpush3.bf16.msra.mxu0 %v1121_v27 }
  0x1d   :  { %1033 = vmatpush3.bf16.msra.mxu1 %v1122_v28  ;;  %1012 = vmatprep.subr.bf16.mxu0 %v1123_v29 }
  0x1e   :  { %1034 = vmatprep.subr.bf16.mxu1 %v1124_v30 }
  0x20   :  { %1013 = vmatpush3.bf16.msra.mxu0 %v1125_v31 }
  0x21   :  { %1035 = vmatpush3.bf16.msra.mxu1 %v1126_v32  ;;  %1042 = vmatprep.subr.bf16.mxu0 %v1127_v41 }
  0x22   :  { %1064 = vmatprep.subr.bf16.mxu1 %v1128_v42 }
  0x23   :  { %626 = vmatmul.mubr.bf16.vlgmr.msra.gmra.mxu0 %v923_v36 }
  0x24   :  { %667 = vmatmul.mubr.bf16.vlgmr.msra.gmra.mxu1 %v925_v39  ;;  %1043 = vmatpush3.bf16.msra.mxu0 %v1129_v43 }
  0x25   :  { %1065 = vmatpush3.bf16.msra.mxu1 %v1130_v44  ;;  %1044 = vmatprep.subr.bf16.mxu0 %v1131_v45 }
  0x26   :  { %1066 = vmatprep.subr.bf16.mxu1 %v1132_v46  ;;  %707 = vmatprep.mubr.bf16.mxu0 %v928_v12 }
  0x28   :  { %1045 = vmatpush3.bf16.msra.mxu0 %v1133_v47 }
  0x29   :  { %1067 = vmatpush3.bf16.msra.mxu1 %v1134_v48  ;;  %1046 = vmatprep.subr.bf16.mxu0 %v1135_v49 }
  0x2a   :  { %1068 = vmatprep.subr.bf16.mxu1 %v1136_v50 }
  0x2c   :  { %1047 = vmatpush3.bf16.msra.mxu0 %v1137_v51 }
  0x2d   :  { %1069 = vmatpush3.bf16.msra.mxu1 %v1138_v52  ;;  %1048 = vmatprep.subr.bf16.mxu0 %v1139_v53 }
  0x2e   :  { %1070 = vmatprep.subr.bf16.mxu1 %v1140_v54 }
  0x30   :  { %1049 = vmatpush3.bf16.msra.mxu0 %v1141_v55 }
  0x31   :  { %1071 = vmatpush3.bf16.msra.mxu1 %v1142_v56  ;;  %1050 = vmatprep.subr.bf16.mxu0 %v1143_v57 }
  0x32   :  { %1072 = vmatprep.subr.bf16.mxu1 %v1144_v58 }
  0x34   :  { %1051 = vmatpush3.bf16.msra.mxu0 %v1145_v59 }
  0x35   :  { %1073 = vmatpush3.bf16.msra.mxu1 %v1146_v60  ;;  %1052 = vmatprep.subr.bf16.mxu0 %v1147_v61 }
  0x36   :  { %1074 = vmatprep.subr.bf16.mxu1 %v1148_v62 }
  0x38   :  { %1053 = vmatpush3.bf16.msra.mxu0 %v1149_v63 }
  0x39   :  { %1075 = vmatpush3.bf16.msra.mxu1 %v1150_v0  ;;  %1054 = vmatprep.subr.bf16.mxu0 %v1151_v1 }
  0x3a   :  { %1076 = vmatprep.subr.bf16.mxu1 %v1152_v2 }
  0x3c   :  { %1055 = vmatpush3.bf16.msra.mxu0 %v1153_v3 }
  0x3d   :  { %1077 = vmatpush3.bf16.msra.mxu1 %v1154_v4  ;;  %1056 = vmatprep.subr.bf16.mxu0 %v1155_v5 }
  0x3e   :  { %1078 = vmatprep.subr.bf16.mxu1 %v1156_v6 }
  0x40   :  { %1057 = vmatpush3.bf16.msra.mxu0 %v1157_v7 }
  0x41   :  { %1079 = vmatpush3.bf16.msra.mxu1 %v1158_v8 }
  0x42   :  { %11 = vsyncpa [#allocation4], 0  ;;  %748 = vmatprep.mubr.bf16.mxu1 %v930_v17  ;;  %840 = vmax.xlane.f32.xlu0 %v1454_v18  ;;  %v1460_v20 = vmul.f32 0.5, %v835_v19  ;;  %v1466_v21 = vld [vmem:[%s1519_s3] sm:$0xff]  ;;  %v765_v63 = vld [vmem:[%s1519_s3 + $0x8] sm:$0xff]  ;;  %v786_v17 = vlaneseq  ;;  %vm810_vm2 = vcmask 7168  }
  0x43   :  { %708 = vmatmul.mubr.bf16.vlgmr.msra.gmra.mxu0 %v927_v11  ;;  %v788_v22 = vld [vmem:[%s1521_s5] sm:$0xff]  ;;  %v789_v0 = vld [vmem:[%s1521_s5 + $0x8] sm:$0xff]  ;;  %s1199_s13 = smov [#allocation3]  }
  0x44   :  { %749 = vmatmul.mubr.bf16.vlgmr.msra.gmra.mxu1 %v929_v16  ;;  %v997_v51 = vld [vmem:[%s1518_s2] ss:$0 sm:$0xff]  ;;  %v787_v19 = vand.u32 127, %v786_v17 }
  0x46   :  { %842 = vmax.xlane.f32.xlu0 %v1460_v20 }
  0x4a   :  { %766 = vmax.xlane.f32.xlu0 %v1466_v21 }
  0x60   :  { %791 = vperm.xlu0 %1093, %v788_v22  }
  0xcb   :  { %v1472_v23 = vpop.xlane.xlu0 %840 }
  0xcc   :  { %v844_v1 = vsub.f32 %v1454_v18, %v1472_v23 }
  0xce   :  { %v846_v3 = vmul.f32 1.442695, %v844_v1 }
  0xcf   :  { %v1474_v24 = vpop.xlane.xlu0 %842 }
  0xd0   :  { %v845_v25 = vsub.f32 %v1460_v20, %v1474_v24 }
  0xd2   :  { %v848_v26 = vmul.f32 1.442695, %v845_v25 }
  0xd3   :  { %v1495_v2 = vpop.xlane.xlu0 %766 }
  0xd4   :  { %1159 = vpow2.f32 %v848_v26  ;;  %v770_v4 = vsub.f32 %v1466_v21, %v1495_v2 }
  0xd5   :  { %1161 = vpow2.f32 %v846_v3 }
  0xd6   :  { %v772_v5 = vmul.f32 1.442695, %v770_v4 }
  0xd8   :  { %1163 = vpow2.f32 %v772_v5 }
  0xdb   :  { %v792_v25 = vpop.permute.xlu0 %791 }
  0xdc   :  { %vm796_vm0 = vcmp.eq.s32.totalorder %v787_v19, %v792_v25 }
  0xe1   :  { %v1160_v27 = vpop.eup %1159 }
  0xe2   :  { %852 = vadd.xlane.f32.xlu0 %v1160_v27  ;;  %v1162_v6 = vpop.eup %1161 }
  0xe3   :  { %v1014_v28 = vpop.f32.mrf.mxu0 }
  0xe4   :  { %v1036_v29 = vpop.f32.mrf.mxu1 }
  0xe5   :  { %v1015_v30 = vpop.f32.mrf.mxu0  ;;  %v1164_v7 = vpop.eup %1163 }
  0xe6   :  { %v1037_v31 = vpop.f32.mrf.mxu1  ;;  %v1016_v35 = vadd.f32 %v1015_v30, %v1014_v28  ;;  %v1198_v28 = vmov 0.0  }
  0xe7   :  { %v1017_v32 = vpop.f32.mrf.mxu0  ;;  %v1038_v36 = vadd.f32 %v1037_v31, %v1036_v29  ;;  %v995_v29 = vsel %vm796_vm0, 1.0, %v1198_v28 }
  0xe8   :  { %v1039_v33 = vpop.f32.mrf.mxu1  ;;  %v802_v31 = vmul.f32 %v995_v29, %v1466_v21 }
  0xe9   :  { %v1018_v34 = vpop.f32.mrf.mxu0  ;;  %v669_v41 = vadd.f32 %v1038_v36, %v1016_v35 }
  0xea   :  { %v1040_v37 = vpop.f32.mrf.mxu1  ;;  %v1019_v42 = vadd.f32 %v1018_v34, %v1017_v32 }
  0xeb   :  { %v1041_v43 = vadd.f32 %v1040_v37, %v1039_v33 }
  0xed   :  { %v672_v52 = vadd.f32 %v1041_v43, %v1019_v42 }
 0x103   :  { %v1058_v38 = vpop.f32.mrf.mxu0 }
 0x104   :  { %v1080_v39 = vpop.f32.mrf.mxu1 }
 0x105   :  { %v1059_v40 = vpop.f32.mrf.mxu0 }
 0x106   :  { %v1060_v44 = vadd.f32 %v1059_v40, %v1058_v38  ;;  %v1081_v45 = vpop.f32.mrf.mxu1 }
 0x107   :  { %v1061_v46 = vpop.f32.mrf.mxu0  ;;  %v1082_v48 = vadd.f32 %v1081_v45, %v1080_v39 }
 0x108   :  { %v710_v47 = vadd.f32 %v1060_v44, %v669_v41  ;;  %v1083_v49 = vpop.f32.mrf.mxu1 }
 0x109   :  { %v1062_v50 = vpop.f32.mrf.mxu0 }
 0x10a   :  { %v751_v53 = vadd.f32 %v1082_v48, %v710_v47  ;;  %v1063_v54 = vadd.f32 %v1062_v50, %v1061_v46  ;;  %v1084_v55 = vpop.f32.mrf.mxu1 }
 0x10b   :  { %v1085_v57 = vadd.f32 %v1084_v55, %v1083_v49 }
 0x10c   :  { %v713_v56 = vadd.f32 %v1063_v54, %v672_v52  ;;  %v832_v58 = vadd.f32 %v997_v51, %v751_v53 }
 0x10e   :  { %v754_v59 = vadd.f32 %v1085_v57, %v713_v56  ;;  %v1481_v60 = vmul.f32 0.5, %v832_v58 }
 0x110   :  { %862 = vmax.xlane.f32.xlu1 %v1481_v60  ;;  %v833_v61 = vadd.f32 %v997_v51, %v754_v59 }
 0x112   :  { %v1484_v62 = vmul.f32 0.5, %v833_v61 }
 0x114   :  { %864 = vmax.xlane.f32.xlu1 %v1484_v62 }
 0x118   :  { %768 = vmax.xlane.f32.xlu1 %v765_v63 }
 0x129   :  { %794 = vperm.xlu1 %1094, %v789_v0  }
 0x14d   :  { %850 = vadd.xlane.f32.xlu1 %v1162_v6 }
 0x151   :  { %776 = vadd.xlane.f32.xlu1 %v1164_v7 }
 0x16b   :  { %v853_v36 = vpop.xlane.xlu0 %852 }
 0x199   :  { %v863_v8 = vpop.xlane.xlu1 %862 }
 0x19a   :  { %v866_v9 = vsub.f32 %v1481_v60, %v863_v8 }
 0x19c   :  { %v868_v10 = vmul.f32 1.442695, %v866_v9 }
 0x19d   :  { %v865_v11 = vpop.xlane.xlu1 %864 }
 0x19e   :  { %1165 = vpow2.f32 %v868_v10  ;;  %v867_v12 = vsub.f32 %v1484_v62, %v865_v11 }
 0x1a0   :  { %v870_v13 = vmul.f32 1.442695, %v867_v12 }
 0x1a1   :  { %v1501_v14 = vpop.xlane.xlu1 %768 }
 0x1a2   :  { %1167 = vpow2.f32 %v870_v13  ;;  %v771_v15 = vsub.f32 %v765_v63, %v1501_v14 }
 0x1a4   :  { %v774_v16 = vmul.f32 1.442695, %v771_v15 }
 0x1a5   :  { %v795_v27 = vpop.permute.xlu1 %794 }
 0x1a6   :  { %1169 = vpow2.f32 %v774_v16  ;;  %vm797_vm1 = vcmp.eq.s32.totalorder %v787_v19, %v795_v27 }
 0x1a7   :  { %v996_v32 = vsel %vm797_vm1, 1.0, %v1198_v28 }
 0x1a8   :  { %v803_v33 = vmul.f32 %v996_v32, %v765_v63 }
 0x1ab   :  { %v1166_v22 = vpop.eup %1165 }
 0x1ac   :  { %872 = vadd.xlane.f32.xlu1 %v1166_v22 }
 0x1af   :  { %v1168_v26 = vpop.eup %1167 }
 0x1b0   :  { %874 = vadd.xlane.f32.xlu1 %v1168_v26 }
 0x1b3   :  { %v1170_v30 = vpop.eup %1169 }
 0x1b4   :  { %778 = vadd.xlane.f32.xlu1 %v1170_v30 }
 0x1b8   :  { %804 = vadd.xlane.f32.xlu1 %v802_v31 }
 0x1bc   :  { %806 = vadd.xlane.f32.xlu1 %v803_v33 }
 0x1d6   :  { %v851_v34 = vpop.xlane.xlu1 %850 }
 0x1d7   :  { %1171 = vlog2.f32 %v851_v34 }
 0x1d8   :  { %1173 = vlog2.f32 %v853_v36 }
 0x1da   :  { %v777_v35 = vpop.xlane.xlu1 %776 }
 0x1e4   :  { %v1172_v40 = vpop.eup %1171 }
 0x1e5   :  { %v1174_v21 = vpop.eup %1173  ;;  %v855_v41 = vmul.f32 0.6931472, %v1172_v40 }
 0x1e6   :  { %v857_v44 = vmul.f32 0.6931472, %v1174_v21 }
 0x1e7   :  { %v858_v46 = vadd.f32 %v855_v41, %v1472_v23 }
 0x1e8   :  { %v859_v50 = vadd.f32 %v857_v44, %v1474_v24 }
 0x1e9   :  { %v860_v57 = vsub.f32 %v1454_v18, %v858_v46 }
 0x1ea   :  { %v861_v23 = vsub.f32 %v1460_v20, %v859_v50 }
 0x235   :  { %v873_v37 = vpop.xlane.xlu1 %872 }
 0x236   :  { %1175 = vlog2.f32 %v873_v37 }
 0x237   :  { %1177 = vlog2.f32 %v777_v35 }
 0x239   :  { %v875_v38 = vpop.xlane.xlu1 %874 }
 0x23a   :  { %1179 = vlog2.f32 %v875_v38 }
 0x23b   :  { %1181 = vrcp.f32 %v873_v37 }
 0x23d   :  { %v779_v39 = vpop.xlane.xlu1 %778 }
 0x23e   :  { %1183 = vlog2.f32 %v779_v39 }
 0x23f   :  { %1185 = vrcp.f32 %v875_v38 }
 0x241   :  { %v805_v52 = vpop.xlane.xlu1 %804 }
 0x243   :  { %v1176_v42 = vpop.eup %1175 }
 0x244   :  { %v1178_v43 = vpop.eup %1177  ;;  %v881_v45 = vmul.f32 0.6931472, %v1176_v42 }
 0x245   :  { %v781_v49 = vmul.f32 0.6931472, %v1178_v43  ;;  %v807_v63 = vpop.xlane.xlu1 %806 }
 0x246   :  { %v884_v47 = vadd.f32 %v881_v45, %v863_v8 }
 0x247   :  { %v1180_v48 = vpop.eup %1179  ;;  %v784_v61 = vadd.f32 %v781_v49, %v1495_v2 }
 0x248   :  { %v883_v51 = vmul.f32 0.6931472, %v1180_v48  ;;  %v886_v53 = vsub.f32 %v1481_v60, %v884_v47  ;;  %v1182_v54 = vpop.eup %1181 }
 0x249   :  { %v808_v24 = vsub.f32 %v784_v61, %v805_v52  ;;  %v877_v4 = vmul.f32 %v1182_v54, %v1166_v22 }
 0x24a   :  { %v885_v56 = vadd.f32 %v883_v51, %v865_v11  ;;  %v888_v1 = vsub.f32 %v886_v53, %v860_v57 }
 0x24b   :  { %v1184_v55 = vpop.eup %1183  ;;  %v811_v8 = vsel %vm810_vm2, %v808_v24, 0.0 }
 0x24c   :  { %v1186_v58 = vpop.eup %1185  ;;  %v783_v59 = vmul.f32 0.6931472, %v1184_v55  ;;  %v887_v0 = vsub.f32 %v1484_v62, %v885_v56  ;;  %v890_v7 = vmul.f32 %v888_v1, %v877_v4 }
 0x24d   :  { %v879_v60 = vmul.f32 %v1186_v58, %v1168_v26 }
 0x24e   :  { %v785_v3 = vadd.f32 %v783_v59, %v1501_v14  ;;  %v889_v5 = vsub.f32 %v887_v0, %v861_v23 }
 0x250   :  { %v809_v6 = vsub.f32 %v785_v3, %v807_v63  ;;  %v891_v18 = vmul.f32 %v889_v5, %v879_v60 }
 0x252   :  { %v812_v9 = vsel %vm810_vm2, %v809_v6, 0.0  ;;  %v892_v10 = vadd.f32 %v891_v18, %v890_v7 }
 0x253   :  { %v813_v2 = vadd.f32 %v812_v9, %v811_v8 }
 0x254   :  { %893 = vadd.xlane.f32.xlu1 %v892_v10 }
 0x255   :  { %814 = vadd.xlane.f32.xlu0 %v813_v2 }
 0x2dd   :  { %v894_v20 = vpop.xlane.xlu1 %893 }
 0x2de   :  { %v815_v11 = vpop.xlane.xlu0 %814  ;;  %v895_v62 = vrot.slane %v894_v20, 4 }
 0x2df   :  { %v816_v12 = vrot.slane %v815_v11, 4 }
 0x2e0   :  { %v896_v13 = vadd.f32 %v895_v62, %v894_v20 }
 0x2e1   :  { %v817_v15 = vadd.f32 %v816_v12, %v815_v11 }
 0x2e2   :  { %v897_v14 = vrot.slane %v896_v13, 2 }
 0x2e3   :  { %v818_v16 = vrot.slane %v817_v15, 2 }
 0x2e4   :  { %v898_v17 = vadd.f32 %v897_v14, %v896_v13 }
 0x2e5   :  { %v819_v19 = vadd.f32 %v818_v16, %v817_v15 }
 0x2e6   :  { %v899_v25 = vrot.slane %v898_v17, 1 }
 0x2e7   :  { %v820_v22 = vrot.slane %v819_v19, 1 }
 0x2e8   :  { %v900_v27 = vadd.f32 %v899_v25, %v898_v17 }
 0x2e9   :  { %v821_v26 = vadd.f32 %v820_v22, %v819_v19 }
 0x2eb   :  { %1086 = vpush %v821_v26 }
 0x2ec   :  { %1088 = vpush %v900_v27 }
 0x31c   :  { %s1087_s3 = spop %1086 }
 0x31d   :  { %s904_s5 = smul.f32 0.5, %s1087_s3  ;;  %s1089_s7 = spop %1088 }
 0x31e   :  { %s902_s8 = smul.f32 4.0, %s1089_s7 }
 0x31f   :  { %s905_s10 = smul.f32 0.0625, %s904_s5 }
 0x320   :  { %s903_s9 = smul.f32 0.00048828125, %s902_s8 }
 0x322   :  { %s906_s11 = smul.f32 0.5, %s903_s9 }
 0x324   :  { %s907_s12 = sadd.f32 %s906_s11, %s905_s10 }
 0x326   :  { %909 = sst [smem:[#allocation3]] %s907_s12 }
 0x327   :  { %917 = dma.smem_to_hbm %s1199_s13, 16, %s1522_s6, [#allocation4]  }
 0x328   :  { %1195 = dma.done.wait [#allocation4], 16  }
 0x329   :  { %1196 = vsyncadd [#allocation4], 4294967280 }
 0x32a   :  { %921 = sfence }
 0x32b   :  { %922 = vsyncpa [#allocation4], 1 }

</bundles_post_ra>
